<compile_context>
chip_gen: v7x
topology: tpu7x:2x2x1
jax: 0.10.0
libtpu: 0.0.40
codegen_flags: <defaults>
</compile_context>

<pallas_src>
import jax
import jax.numpy as jnp
from jax import lax
from jax.experimental import pallas as pl
from jax.experimental.pallas import tpu as pltpu


def cross_gate_kernel(x1_ref, x2_ref, w1_ref, b1_ref, w2_ref, b2_ref, out_ref):
    """One (TM, D) batch tile -> one (TM, 2*D) output tile: [h1 | h2]."""
    x1 = x1_ref[...]
    x2 = x2_ref[...]
    D = x1.shape[-1]

    mm_dtype = w1_ref.dtype  # bf16 weights => bf16 MXU inputs; f32 otherwise
    # Contract x's dim 1 with w's dim 1 (PyTorch (out, in) layout, no transpose).
    dn = (((1,), (1,)), ((), ()))

    # Linear1(x1) -> gate for x2 -> h2 lives in out[:, D:]
    z1 = lax.dot_general(x1.astype(mm_dtype), w1_ref[...], dn,
                         preferred_element_type=jnp.float32) + b1_ref[...]
    g1 = jax.nn.sigmoid(z1)                       # f32 sigmoid (EUP), f32 gating
    out_ref[:, D:] = (g1 * x2.astype(jnp.float32)).astype(out_ref.dtype)

    # Linear2(x2) -> gate for x1 -> h1 lives in out[:, :D]
    z2 = lax.dot_general(x2.astype(mm_dtype), w2_ref[...], dn,
                         preferred_element_type=jnp.float32) + b2_ref[...]
    g2 = jax.nn.sigmoid(z2)
    out_ref[:, :D] = (g2 * x1.astype(jnp.float32)).astype(out_ref.dtype)


def cross_gate(x1, x2, w1, b1, w2, b2, *, block_m=256, matmul_dtype=None):
    """x1, x2: (B, D). w*: (D, D) PyTorch-layout (out, in). b*: (D,).

    matmul_dtype: optionally jnp.bfloat16 to feed the MXU bf16 inputs
    (accumulation / sigmoid / gating stay f32).  Default None keeps f32.
    """
    B, D = x1.shape
    out_dtype = x1.dtype

    if matmul_dtype is not None:
        w1 = w1.astype(matmul_dtype)
        w2 = w2.astype(matmul_dtype)

    # Biases as (1, D) rows for lane-wise broadcast in the kernel (f32).
    b1r = b1.astype(jnp.float32).reshape(1, D)
    b2r = b2.astype(jnp.float32).reshape(1, D)

    # Batch tile: multiple of 8 sublanes; pad B up to a tile multiple if needed.
    tm = min(block_m, max(B, 8))
    tm = max(8, (tm // 8) * 8)
    Bp = pl.cdiv(B, tm) * tm
    if Bp != B:
        pad = ((0, Bp - B), (0, 0))
        x1 = jnp.pad(x1, pad)
        x2 = jnp.pad(x2, pad)

    grid = (Bp // tm,)

    # VMEM budget: resident weights + double-buffered activation/output tiles,
    # with ~50% headroom; clamp to sane bounds (v7x physical VMEM is 64 MiB).
    w_bytes = 2 * D * D * jnp.dtype(w1.dtype).itemsize
    act_bytes = 2 * (2 * tm * D + tm * 2 * D) * 4   # double-buffered x1, x2, out
    vmem_limit = int(min(max(int(1.5 * (w_bytes + act_bytes)), 32 * 2**20),
                         100 * 2**20))

    out = pl.pallas_call(
        cross_gate_kernel,
        out_shape=jax.ShapeDtypeStruct((Bp, 2 * D), out_dtype),
        grid=grid,
        in_specs=[
            pl.BlockSpec((tm, D), lambda i: (i, 0)),   # x1 batch tile
            pl.BlockSpec((tm, D), lambda i: (i, 0)),   # x2 batch tile
            pl.BlockSpec((D, D), lambda i: (0, 0)),    # W1 (out,in), resident
            pl.BlockSpec((1, D), lambda i: (0, 0)),    # b1, resident
            pl.BlockSpec((D, D), lambda i: (0, 0)),    # W2 (out,in), resident
            pl.BlockSpec((1, D), lambda i: (0, 0)),    # b2, resident
        ],
        out_specs=pl.BlockSpec((tm, 2 * D), lambda i: (i, 0)),
        compiler_params=pltpu.CompilerParams(
            dimension_semantics=("parallel",),
            vmem_limit_bytes=vmem_limit,
        ),
    )(x1, x2, w1, b1r, w2, b2r)

    return out[:B] if Bp != B else out
    # TODO(synk): for very large D (f32 weights > ~40 MiB), add a D_out grid
    # axis so only (D, TN) weight slabs are resident (required on v7x 64 MiB).


def cross_gate_ref(x1, x2, w1, b1, w2, b2):
    g1 = jax.nn.sigmoid(x1 @ w1.T + b1)
    h2 = g1 * x2
    g2 = jax.nn.sigmoid(x2 @ w2.T + b2)
    h1 = g2 * x1
    return jnp.concatenate([h1, h2], axis=-1)


if __name__ == "__main__":
    key = jax.random.PRNGKey(0)
    B, D = 8, 32  # small demo shapes: batch=8, input_dim=32

    k1, k2, k3, k4, k5, k6 = jax.random.split(key, 6)
    x1 = jax.random.normal(k1, (B, D), dtype=jnp.float32)
    x2 = jax.random.normal(k2, (B, D), dtype=jnp.float32)

    # PyTorch nn.Linear shapes: weight (out, in), bias (out,)
    bound = 1.0 / jnp.sqrt(D)
    w1 = jax.random.uniform(k3, (D, D), minval=-bound, maxval=bound, dtype=jnp.float32)
    b1 = jax.random.uniform(k4, (D,), minval=-bound, maxval=bound, dtype=jnp.float32)
    w2 = jax.random.uniform(k5, (D, D), minval=-bound, maxval=bound, dtype=jnp.float32)
    b2 = jax.random.uniform(k6, (D,), minval=-bound, maxval=bound, dtype=jnp.float32)

    out = cross_gate(x1, x2, w1, b1, w2, b2)
    out = jax.block_until_ready(out)

    ref = cross_gate_ref(x1, x2, w1, b1, w2, b2)
    assert out.shape == (B, 2 * D), out.shape
    assert jnp.allclose(out, ref, atol=1e-5, rtol=1e-5), float(jnp.max(jnp.abs(out - ref)))

    print("KERNEL_OK")
</pallas_src>

<mosaic_0001>
module attributes {stable_mosaic.version = 11 : i64} {
  func.func @cross_gate_kernel(%arg0: i32, %arg1: memref<8x32xf32, #tpu.memory_space<vmem>>, %arg2: memref<8x32xf32, #tpu.memory_space<vmem>>, %arg3: memref<32x32xf32, #tpu.memory_space<vmem>>, %arg4: memref<1x32xf32, #tpu.memory_space<vmem>>, %arg5: memref<32x32xf32, #tpu.memory_space<vmem>>, %arg6: memref<1x32xf32, #tpu.memory_space<vmem>>, %arg7: memref<8x64xf32, #tpu.memory_space<vmem>>) attributes {dimension_semantics = [#tpu.dimension_semantics<parallel>], iteration_bounds = array<i64: 1>, scalar_prefetch = 0 : i64, scratch_operands = 0 : i64, tpu.core_type = #tpu.core_type<tc>, window_params = [{transform_indices = @transform_0, window_bounds = array<i64: 8, 32>}, {transform_indices = @transform_1, window_bounds = array<i64: 8, 32>}, {pipeline_mode = #tpu.pipeline_mode<synchronous>, transform_indices = @transform_2, window_bounds = array<i64: 32, 32>}, {pipeline_mode = #tpu.pipeline_mode<synchronous>, transform_indices = @transform_3, window_bounds = array<i64: 1, 32>}, {pipeline_mode = #tpu.pipeline_mode<synchronous>, transform_indices = @transform_4, window_bounds = array<i64: 32, 32>}, {pipeline_mode = #tpu.pipeline_mode<synchronous>, transform_indices = @transform_5, window_bounds = array<i64: 1, 32>}, {transform_indices = @transform_6, window_bounds = array<i64: 8, 64>}]} {
    %c0 = arith.constant 0 : index
    %c0_0 = arith.constant 0 : index
    %0 = vector.load %arg1[%c0, %c0_0] : memref<8x32xf32, #tpu.memory_space<vmem>>, vector<8x32xf32>
    %c0_1 = arith.constant 0 : index
    %c0_2 = arith.constant 0 : index
    %1 = vector.load %arg2[%c0_1, %c0_2] : memref<8x32xf32, #tpu.memory_space<vmem>>, vector<8x32xf32>
    %c0_3 = arith.constant 0 : index
    %c0_4 = arith.constant 0 : index
    %2 = vector.load %arg3[%c0_3, %c0_4] : memref<32x32xf32, #tpu.memory_space<vmem>>, vector<32x32xf32>
    %cst = arith.constant dense<0.000000e+00> : vector<8x32xf32>
    %3 = tpu.matmul %0, %2, %cst {dimension_numbers = #tpu.dot_dimension_numbers<[1], [1], [0], [0], [0, 0, 1, 0], [], []>} : vector<8x32xf32>, vector<32x32xf32>, vector<8x32xf32> -> vector<8x32xf32>
    %c0_5 = arith.constant 0 : index
    %c0_6 = arith.constant 0 : index
    %4 = vector.load %arg4[%c0_5, %c0_6] : memref<1x32xf32, #tpu.memory_space<vmem>>, vector<1x32xf32>
    %5 = vector.broadcast %4 : vector<1x32xf32> to vector<8x32xf32>
    %6 = arith.addf %3, %5 : vector<8x32xf32>
    %7 = arith.negf %6 : vector<8x32xf32>
    %8 = math.exp %7 : vector<8x32xf32>
    %cst_7 = arith.constant 1.000000e+00 : f32
    %9 = vector.broadcast %cst_7 : f32 to vector<8x32xf32>
    %10 = arith.addf %9, %8 : vector<8x32xf32>
    %11 = arith.divf %9, %10 : vector<8x32xf32>
    %12 = arith.mulf %11, %1 : vector<8x32xf32>
    %c0_8 = arith.constant 0 : index
    %c32 = arith.constant 32 : index
    %13 = vector.load %arg7[%c0_8, %c32] : memref<8x64xf32, #tpu.memory_space<vmem>>, vector<8x32xf32>
    tpu.vector_store %arg7[%c0_8, %c32], %12 {strides = array<i32>} : memref<8x64xf32, #tpu.memory_space<vmem>>, vector<8x32xf32>,
    %c0_9 = arith.constant 0 : index
    %c0_10 = arith.constant 0 : index
    %14 = vector.load %arg5[%c0_9, %c0_10] : memref<32x32xf32, #tpu.memory_space<vmem>>, vector<32x32xf32>
    %cst_11 = arith.constant dense<0.000000e+00> : vector<8x32xf32>
    %15 = tpu.matmul %1, %14, %cst_11 {dimension_numbers = #tpu.dot_dimension_numbers<[1], [1], [0], [0], [0, 0, 1, 0], [], []>} : vector<8x32xf32>, vector<32x32xf32>, vector<8x32xf32> -> vector<8x32xf32>
    %c0_12 = arith.constant 0 : index
    %c0_13 = arith.constant 0 : index
    %16 = vector.load %arg6[%c0_12, %c0_13] : memref<1x32xf32, #tpu.memory_space<vmem>>, vector<1x32xf32>
    %17 = vector.broadcast %16 : vector<1x32xf32> to vector<8x32xf32>
    %18 = arith.addf %15, %17 : vector<8x32xf32>
    %19 = arith.negf %18 : vector<8x32xf32>
    %20 = math.exp %19 : vector<8x32xf32>
    %cst_14 = arith.constant 1.000000e+00 : f32
    %21 = vector.broadcast %cst_14 : f32 to vector<8x32xf32>
    %22 = arith.addf %21, %20 : vector<8x32xf32>
    %23 = arith.divf %21, %22 : vector<8x32xf32>
    %24 = arith.mulf %23, %0 : vector<8x32xf32>
    %c0_15 = arith.constant 0 : index
    %c0_16 = arith.constant 0 : index
    %25 = vector.load %arg7[%c0_15, %c0_16] : memref<8x64xf32, #tpu.memory_space<vmem>>, vector<8x32xf32>
    tpu.vector_store %arg7[%c0_15, %c0_16], %24 {strides = array<i32>} : memref<8x64xf32, #tpu.memory_space<vmem>>, vector<8x32xf32>,
    return
  }
  func.func @transform_0(%arg0: i32) -> (i32, i32) {
    %c0_i32 = arith.constant 0 : i32
    %c0_i32_0 = arith.constant 0 : i32
    return %arg0, %c0_i32 : i32, i32
  }
  func.func @transform_1(%arg0: i32) -> (i32, i32) {
    %c0_i32 = arith.constant 0 : i32
    %c0_i32_0 = arith.constant 0 : i32
    return %arg0, %c0_i32 : i32, i32
  }
  func.func @transform_2(%arg0: i32) -> (i32, i32) {
    %c0_i32 = arith.constant 0 : i32
    %c0_i32_0 = arith.constant 0 : i32
    %c0_i32_1 = arith.constant 0 : i32
    return %c0_i32, %c0_i32_0 : i32, i32
  }
  func.func @transform_3(%arg0: i32) -> (i32, i32) {
    %c0_i32 = arith.constant 0 : i32
    %c0_i32_0 = arith.constant 0 : i32
    %c0_i32_1 = arith.constant 0 : i32
    return %c0_i32, %c0_i32_0 : i32, i32
  }
  func.func @transform_4(%arg0: i32) -> (i32, i32) {
    %c0_i32 = arith.constant 0 : i32
    %c0_i32_0 = arith.constant 0 : i32
    %c0_i32_1 = arith.constant 0 : i32
    return %c0_i32, %c0_i32_0 : i32, i32
  }
  func.func @transform_5(%arg0: i32) -> (i32, i32) {
    %c0_i32 = arith.constant 0 : i32
    %c0_i32_0 = arith.constant 0 : i32
    %c0_i32_1 = arith.constant 0 : i32
    return %c0_i32, %c0_i32_0 : i32, i32
  }
  func.func @transform_6(%arg0: i32) -> (i32, i32) {
    %c0_i32 = arith.constant 0 : i32
    %c0_i32_0 = arith.constant 0 : i32
    return %arg0, %c0_i32 : i32, i32
  }
}

</mosaic_0001>

<bundles_post_ra>
// kernel: tpu_custom_call.1
= control target key start
LH: loop header
LB: loop body
LE: loop exit
PB: predicated region body
PF: predicated region fallthrough
CT: control target
= control target key end

     0   :  { %11 = vsyncpa [#allocation3], 0  ;;  %s636_s0 = inlined_call_operand.hbm [shape: f32[8,32], index: 0, kind: input, shape index: {}]   ;;  %s637_s1 = inlined_call_operand.hbm [shape: f32[8,32], index: 1, kind: input, shape index: {}]   ;;  %s638_s2 = inlined_call_operand.hbm [shape: f32[32,32], index: 2, kind: input, shape index: {}]   ;;  %s639_s3 = inlined_call_operand.vmem [shape: f32[1,32], index: 3, kind: input, shape index: {}]   ;;  %s640_s4 = inlined_call_operand.hbm [shape: f32[32,32], index: 4, kind: input, shape index: {}]   ;;  %s641_s5 = inlined_call_operand.vmem [shape: f32[1,32], index: 5, kind: input, shape index: {}]   ;;  %s642_s6 = inlined_call_operand.hbm [shape: f32[8,64], index: 6, kind: output, shape index: {}]  }
   0x1   :  { %12 = vsyncpa [#allocation6], 0 }
   0x2   :  { %13 = vsyncpa [#allocation9], 0 }
   0x3   :  { %14 = vsyncpa [#allocation4], 0  ;;  %s507_s21 = smov [#allocation5]   ;;  %s508_s23 = smov [#allocation2]  }
   0x4   :  { %s31_s22 = sshll.u32 %s507_s21, 4  ;;  %s21_s24 = sshll.u32 %s508_s23, 4  ;;  %s32_s22 = int_to_ptr.vmem [resolvable:$true] %s31_s22  ;;  %s22_s24 = int_to_ptr.vmem [resolvable:$true] %s21_s24 }
   0x5   :  { %s389_s27 = scalar_lea.hbm %s637_s1, 128 }
   0x6   :  { %p390_p0 = scmp.ne.s32.totalorder %s637_s1, %s389_s27  ;;  %p393_p1 = scmp.lt.u32.totalorder %s389_s27, %s637_s1 }
   0x8   :  { %p395_p2 = pnand %p393_p1, %p390_p0 }
   0xa   :  { %398 = shalt.err (!%p395_p2)
}
   0xb   :  { %s399_s8 = scalar_lea.vmem %s32_s22, 128  ;;  %p404_p4 = scmp.lt.s32.totalorder %s32_s22, %s32_s22 }
   0xc   :  { %p400_p3 = scmp.ne.s32.totalorder %s32_s22, %s399_s8  ;;  %p405_p5 = scmp.lt.s32.totalorder %s399_s8, %s399_s8 }
   0xe   :  { %p406_p6 = por %p405_p5, %p404_p4 }
  0x10   :  { %p407_p7 = pnand %p406_p6, %p400_p3 }
  0x12   :  { %410 = shalt.err (!%p407_p7)
}
  0x13   :  { %34 = dma.hbm_to_vmem [thread:$0]  %s637_s1, 128, %s32_s22, [#allocation6]  }
  0x14   :  { %s411_s13 = scalar_lea.hbm %s636_s0, 128 }
  0x15   :  { %p412_p8 = scmp.ne.s32.totalorder %s636_s0, %s411_s13  ;;  %p415_p9 = scmp.lt.u32.totalorder %s411_s13, %s636_s0 }
  0x17   :  { %p417_p10 = pnand %p415_p9, %p412_p8 }
  0x19   :  { %420 = shalt.err (!%p417_p10)
}
  0x1a   :  { %s421_s18 = scalar_lea.vmem %s22_s24, 128  ;;  %p426_p12 = scmp.lt.s32.totalorder %s22_s24, %s22_s24 }
  0x1b   :  { %p422_p11 = scmp.ne.s32.totalorder %s22_s24, %s421_s18  ;;  %p427_p13 = scmp.lt.s32.totalorder %s421_s18, %s421_s18 }
  0x1d   :  { %p428_p0 = por %p427_p13, %p426_p12 }
  0x1f   :  { %p429_p1 = pnand %p428_p0, %p422_p11 }
  0x21   :  { %432 = shalt.err (!%p429_p1)
}
  0x22   :  { %24 = dma.hbm_to_vmem [thread:$0]  %s636_s0, 128, %s22_s24, [#allocation3]  }
  0x23   :  { %s509_s20 = smov [#allocation7]   ;;  %s433_s25 = scalar_lea.hbm %s638_s2, 512 }
  0x24   :  { %s40_s21 = sshll.u32 %s509_s20, 4  ;;  %p434_p2 = scmp.ne.s32.totalorder %s638_s2, %s433_s25  ;;  %s41_s21 = int_to_ptr.vmem [resolvable:$true] %s40_s21 }
  0x25   :  { %p437_p3 = scmp.lt.u32.totalorder %s433_s25, %s638_s2 }
  0x27   :  { %p439_p4 = pnand %p437_p3, %p434_p2 }
  0x29   :  { %442 = shalt.err (!%p439_p4)
}
  0x2a   :  { %s443_s30 = scalar_lea.vmem %s41_s21, 512  ;;  %p448_p6 = scmp.lt.s32.totalorder %s41_s21, %s41_s21 }
  0x2b   :  { %p444_p5 = scmp.ne.s32.totalorder %s41_s21, %s443_s30  ;;  %p449_p7 = scmp.lt.s32.totalorder %s443_s30, %s443_s30 }
  0x2d   :  { %p450_p8 = por %p449_p7, %p448_p6 }
  0x2f   :  { %p451_p9 = pnand %p450_p8, %p444_p5 }
  0x31   :  { %454 = shalt.err (!%p451_p9)
}
  0x32   :  { %s510_s0 = smov 128   ;;  %s511_s24 = smov 8  }
  0x33   :  { %46 = dma.hbm_to_vmem [thread:$0]  %s638_s2, 512, %s41_s21, [#allocation6], %s510_s0, %s510_s0, %s511_s24  }
  0x34   :  { %s512_s9 = smov [#allocation8]   ;;  %s455_s13 = scalar_lea.hbm %s640_s4, 512 }
  0x35   :  { %s54_s10 = sshll.u32 %s512_s9, 4  ;;  %p456_p10 = scmp.ne.s32.totalorder %s640_s4, %s455_s13  ;;  %s55_s10 = int_to_ptr.vmem [resolvable:$true] %s54_s10 }
  0x36   :  { %p459_p11 = scmp.lt.u32.totalorder %s455_s13, %s640_s4 }
  0x38   :  { %p461_p12 = pnand %p459_p11, %p456_p10 }
  0x3a   :  { %464 = shalt.err (!%p461_p12)
}
  0x3b   :  { %s465_s18 = scalar_lea.vmem %s55_s10, 512  ;;  %p470_p0 = scmp.lt.s32.totalorder %s55_s10, %s55_s10 }
  0x3c   :  { %p466_p13 = scmp.ne.s32.totalorder %s55_s10, %s465_s18  ;;  %p471_p1 = scmp.lt.s32.totalorder %s465_s18, %s465_s18 }
  0x3e   :  { %p472_p2 = por %p471_p1, %p470_p0 }
  0x40   :  { %p473_p3 = pnand %p472_p2, %p466_p13 }
  0x42   :  { %476 = shalt.err (!%p473_p3)
}
  0x43   :  { %60 = dma.hbm_to_vmem [thread:$0]  %s640_s4, 512, %s55_s10, [#allocation9], %s510_s0, %s510_s0, %s511_s24  }
  0x44   :  { %499 = dma.done.wait [#allocation3], 128  }
  0x45   :  { %500 = vsyncadd [#allocation3], 4294967168 }
  0x46   :  { %501 = dma.done.wait [#allocation6], 640  }
  0x47   :  { %502 = vsyncadd [#allocation6], 4294966656 }
  0x48   :  { %503 = dma.done.wait [#allocation9], 512  }
  0x49   :  { %504 = vsyncadd [#allocation9], 4294966784  ;;  %v513_v0 = vmov 0.0|0.0   ;;  %vm514_vm0 = vmmov 0   ;;  %v515_v1 = vmov 0.0   ;;  %vm88_vm1 = vcmask 261120  }
  0x4a   :  { %354 = vmatprep.subr.bf16.mxu0 %v513_v0  ;;  %340 = vmatprep.mubr.msk.f32.mxu0 %vm514_vm0, %v515_v1  ;;  %v77_v2 = vld [vmem:[#allocation7] sm:$0xff]  ;;  %v78_v3 = vld [vmem:[#allocation7 + $0x8] sm:$0xff]  ;;  %vm603_vm2 = vmpackc.low %vm88_vm1, %vm88_vm1  ;;  %s516_s20 = smov 32   ;;  %vm185_vm3 = vcmask 523520  }
  0x4b   :  { %362 = vmatprep.subr.bf16.mxu1 %v513_v0  ;;  %351 = vmatprep.mubr.msk.f32.mxu1 %vm514_vm0, %v515_v1  ;;  %v355_v5 = vpack.c.bf16 %v78_v3, %v77_v2  ;;  %v187_v6 = vld [vmem:[#allocation8] sm:$0xff]  ;;  %v188_v7 = vld [vmem:[#allocation8 + $0x8] sm:$0xff]  ;;  %v79_v9 = vld [vmem:[#allocation7 + $0x10] sm:$0xff] }
  0x4c   :  { %v363_v8 = vpack.c.bf16 %v188_v7, %v187_v6  ;;  %v80_v10 = vld [vmem:[#allocation7 + $0x18] sm:$0xff]  ;;  %v189_v11 = vld [vmem:[#allocation8 + $0x10] sm:$0xff] }
  0x4d   :  { %357 = vmatpush3.bf16.xpose.msk.msra.mxu0 %vm603_vm2, %v355_v5  ;;  %v190_v12 = vld [vmem:[#allocation8 + $0x18] sm:$0xff]  ;;  %v359_v13 = vpack.c.bf16 %v80_v10, %v79_v9  ;;  %v75_v15 = vld [vmem:[#allocation2] sm:$0xff] }
  0x4e   :  { %358 = vmatprep.subr.bf16.mxu0 %v513_v0  ;;  %365 = vmatpush3.bf16.xpose.msk.msra.mxu1 %vm603_vm2, %v363_v8  ;;  %v367_v14 = vpack.c.bf16 %v190_v12, %v189_v11  ;;  %v76_v16 = vld [vmem:[#allocation5] sm:$0xff]  ;;  %v308_v17 = vld [vmem:[%s639_s3] ss:$0 sm:$0xff]  ;;  %s517_s3 = smov [#allocation10]  }
  0x4f   :  { %366 = vmatprep.subr.bf16.mxu1 %v513_v0  ;;  %v315_v28 = vld [vmem:[%s641_s5] ss:$0 sm:$0xff]  ;;  %s297_s23 = sshll.u32 %s517_s3, 4  ;;  %s298_s23 = int_to_ptr.vmem [resolvable:$true] %s297_s23 }
  0x50   :  { %s477_s25 = scalar_lea.vmem %s298_s23, 128  ;;  %p482_p5 = scmp.lt.s32.totalorder %s298_s23, %s298_s23 }
  0x51   :  { %p478_p4 = scmp.ne.s32.totalorder %s298_s23, %s477_s25  ;;  %p483_p6 = scmp.lt.s32.totalorder %s477_s25, %s477_s25 }
  0x53   :  { %p484_p7 = por %p483_p6, %p482_p5 }
  0x55   :  { %361 = vmatpush3.bf16.xpose.msk.msra.mxu0 %vm603_vm2, %v359_v13  ;;  %p485_p8 = pnand %p484_p7, %p478_p4 }
  0x56   :  { %369 = vmatpush3.bf16.xpose.msk.msra.mxu1 %vm603_vm2, %v367_v14 }
  0x5c   :  { %341 = vmatmul.mubr.msk.f32.vlgmr.msra.gmra.mrb[0].mxu0 %vm88_vm1, %v75_v15 }
  0x5d   :  { %352 = vmatmul.mubr.msk.f32.vlgmr.msra.gmra.mrb[0].mxu1 %vm88_vm1, %v76_v16 }
 0x12f   :  { %v170_v18 = vpop.f32.mrb[0].mxu0 }
 0x130   :  { %v171_v19 = vadd.f32 %v308_v17, %v170_v18  ;;  %v342_v20 = vpop.f32.mrb[1].mxu0  ;;  %v279_v21 = vpop.f32.mrb[0].mxu1 }
 0x131   :  { %v353_v23 = vpop.f32.mrb[1].mxu1  ;;  %v280_v29 = vadd.f32 %v315_v28, %v279_v21 }
 0x132   :  { %v314_v22 = vmul.f32 -1.442695, %v171_v19 }
 0x133   :  { %v321_v30 = vmul.f32 -1.442695, %v280_v29 }
 0x134   :  { %381 = vpow2.f32 %v314_v22 }
 0x13e   :  { %v382_v24 = vpop.eup %381 }
 0x13f   :  { %v177_v25 = vadd.f32 1.0, %v382_v24 }
 0x141   :  { %383 = vrcp.f32 %v177_v25 }
 0x142   :  { %385 = vpow2.f32 %v321_v30 }
 0x14b   :  { %v384_v26 = vpop.eup %383 }
 0x14c   :  { %v180_v27 = vmul.f32 %v384_v26, %v76_v16  ;;  %v386_v31 = vpop.eup %385 }
 0x14d   :  { %v286_v32 = vadd.f32 1.0, %v386_v31 }
 0x14e   :  { %182 = vrot.lane.b32.xlu0 %v180_v27, %s516_s20 }
 0x14f   :  { %387 = vrcp.f32 %v286_v32 }
 0x159   :  { %v388_v33 = vpop.eup %387 }
 0x15a   :  { %v289_v34 = vmul.f32 %v388_v33, %v75_v15 }
 0x1c0   :  { %v183_v35 = vpop.permute.xlu0 %182 }
 0x1c1   :  { %186 = vst.msk [vmem:[#allocation10] sm:$0xff] %vm185_vm3, %v183_v35 }
 0x1c2   :  { %290 = vst.msk [vmem:[#allocation10] sm:$0xff] %vm88_vm1, %v289_v34 }
 0x1c3   :  { %488 = shalt.err (!%p485_p8)
}
 0x1c4   :  { %s489_s27 = scalar_lea.hbm %s642_s6, 128 }
 0x1c5   :  { %p490_p9 = scmp.ne.s32.totalorder %s642_s6, %s489_s27  ;;  %p493_p10 = scmp.lt.u32.totalorder %s489_s27, %s642_s6 }
 0x1c7   :  { %p495_p11 = pnand %p493_p10, %p490_p9 }
 0x1c9   :  { %498 = shalt.err (!%p495_p11)
}
 0x1ca   :  { %300 = dma.vmem_to_hbm [thread:$0]  %s298_s23, 128, %s642_s6, [#allocation4]  }
 0x1cb   :  { %505 = dma.done.wait [#allocation4], 128  }
 0x1cc   :  { %506 = vsyncadd [#allocation4], 4294967168 }
 0x1cd   :  { %304 = vsyncpa [#allocation3], 1 }
 0x1ce   :  { %305 = vsyncpa [#allocation6], 1 }
 0x1cf   :  { %306 = vsyncpa [#allocation9], 1 }
 0x1d0   :  { %307 = vsyncpa [#allocation4], 1 }

</bundles_post_ra>
